<compile_context>
chip_gen: v5e
topology: v5e:2x2
jax: 0.10.0
libtpu: 0.0.40
codegen_flags: <defaults>
</compile_context>

<pallas_src>
import functools

import jax
import jax.numpy as jnp
from jax.experimental import pallas as pl
from jax.experimental.pallas import tpu as pltpu

# --- model hyper-parameters (small, consistent with the module) ---
BATCH = 2
SEQ = 8
MODEL_DIM = 32
NUM_HEADS = 4
KEY_SIZE = 8          # num_heads * key_size == 32
FF_DIM = 64


def decoder_layer_kernel(x_ref, bias_ref, wqkv_ref, bqkv_ref, wo_ref, bo_ref,
                         w1_ref, b1_ref, w2_ref, b2_ref, out_ref,
                         *, num_heads, key_size):
    """Single invocation. x_ref: (T, D) with batch folded into T; weights pre-packed."""
    x = x_ref[...]                                            # (T, D), T = B*S
    bias = bias_ref[...]                                      # (T, T) additive causal/block mask
    hk = num_heads * key_size

    # ---- fused Q/K/V projection: one lane-dense 2D matmul (scale folded into weights) ----
    qkv = jnp.dot(x, wqkv_ref[...],
                  preferred_element_type=jnp.float32) + bqkv_ref[...]   # (T, 3*H*K)

    # ---- per-head attention (static lane slices; H=4 unrolled) ----
    ctx_heads = []
    for h in range(num_heads):
        q_h = qkv[:, h * key_size:(h + 1) * key_size]                        # (T, K)
        k_h = qkv[:, hk + h * key_size: hk + (h + 1) * key_size]             # (T, K)
        v_h = qkv[:, 2 * hk + h * key_size: 2 * hk + (h + 1) * key_size]     # (T, K)

        # scores via trans_b contraction (no materialized k.T)
        s = jax.lax.dot_general(
            q_h, k_h, dimension_numbers=(((1,), (1,)), ((), ())),
            preferred_element_type=jnp.float32) + bias                       # (T, T)

        # softmax (exact normalization)
        m = jnp.max(s, axis=-1, keepdims=True)
        p = jnp.exp(s - m)
        p = p / jnp.sum(p, axis=-1, keepdims=True)

        ctx_heads.append(jnp.dot(p, v_h, preferred_element_type=jnp.float32))  # (T, K)

    # ---- fused output projection: lane concat -> one lane-dense 2D matmul ----
    ctx2d = jnp.concatenate(ctx_heads, axis=-1)                              # (T, H*K)
    attn_out = jnp.dot(ctx2d, wo_ref[...],
                       preferred_element_type=jnp.float32) + bo_ref[...]     # (T, D)

    x1 = x + attn_out

    # ---- feed-forward (Linear -> ReLU -> Linear) + residual ----
    h1 = jnp.dot(x1, w1_ref[...], preferred_element_type=jnp.float32) + b1_ref[...]
    h1 = jnp.maximum(h1, jnp.float32(0.0))
    ff = jnp.dot(h1, w2_ref[...], preferred_element_type=jnp.float32) + b2_ref[...]

    out_ref[...] = x1 + ff


def transformer_decoder_layer(x, params):
    """x: (B, S, D) float32.  params: dict of (in, out)-layout weights / (1, out) biases."""
    b, s, d = x.shape
    t = b * s

    # --- one-time re-layout on the JAX side (kept out of the kernel) ---
    scale = 1.0 / jnp.sqrt(jnp.float32(KEY_SIZE))
    # fold the attention scale into the q-third of the packed qkv weights / bias
    wqkv = jnp.concatenate(
        [params["wq"] * scale, params["wk"], params["wv"]], axis=1)          # (D, 3*H*K)
    bqkv = jnp.concatenate(
        [params["bq"] * scale, params["bk"], params["bv"]], axis=1)          # (1, 3*H*K)

    # block-diagonal causal additive bias over the folded (B*S) token axis
    row = jnp.arange(t, dtype=jnp.int32)[:, None]
    col = jnp.arange(t, dtype=jnp.int32)[None, :]
    keep = (col <= row) & ((row // s) == (col // s))
    bias = jnp.where(keep, 0.0, -1e30).astype(jnp.float32)                   # (T, T)

    x2d = x.reshape(t, d)                                                    # fold batch into tokens

    args = [x2d, bias, wqkv, bqkv, params["wo"], params["bo"],
            params["w1"], params["b1"], params["w2"], params["b2"]]

    kernel = functools.partial(decoder_layer_kernel,
                               num_heads=NUM_HEADS, key_size=KEY_SIZE)

    vmem_spec = pl.BlockSpec(memory_space=pltpu.MemorySpace.VMEM)
    out2d = pl.pallas_call(
        kernel,
        out_shape=jax.ShapeDtypeStruct((t, d), jnp.float32),
        in_specs=[vmem_spec for _ in args],       # whole problem resident in VMEM, no grid loop
        out_specs=vmem_spec,
    )(*args)
    return out2d.reshape(b, s, d)


def init_params(key):
    """Deterministic synthetic parameters.  Weights stored as (in, out)."""
    ks = jax.random.split(key, 12)
    hk = NUM_HEADS * KEY_SIZE

    def w(k, fan_in, fan_out):
        return (jax.random.normal(k, (fan_in, fan_out), jnp.float32)
                / jnp.sqrt(jnp.float32(fan_in)))

    def bvec(k, fan_out):
        return 0.01 * jax.random.normal(k, (1, fan_out), jnp.float32)

    return {
        "wq": w(ks[0], MODEL_DIM, hk), "bq": bvec(ks[1], hk),
        "wk": w(ks[2], MODEL_DIM, hk), "bk": bvec(ks[3], hk),
        "wv": w(ks[4], MODEL_DIM, hk), "bv": bvec(ks[5], hk),
        "wo": w(ks[6], hk, MODEL_DIM), "bo": bvec(ks[7], MODEL_DIM),
        "w1": w(ks[8], MODEL_DIM, FF_DIM), "b1": bvec(ks[9], FF_DIM),
        "w2": w(ks[10], FF_DIM, MODEL_DIM), "b2": bvec(ks[11], MODEL_DIM),
    }


def reference_forward(x, p, precision=jax.lax.Precision.HIGHEST):
    """Pure-JAX reference mirroring the PyTorch forward (full f32 matmul precision)."""
    b, s, d = x.shape

    def lin(inp, w, bias):
        return jnp.einsum("...i,ij->...j", inp, w, precision=precision) + bias

    q = lin(x, p["wq"], p["bq"]).reshape(b, s, NUM_HEADS, KEY_SIZE).transpose(0, 2, 1, 3)
    k = lin(x, p["wk"], p["bk"]).reshape(b, s, NUM_HEADS, KEY_SIZE).transpose(0, 2, 1, 3)
    v = lin(x, p["wv"], p["bv"]).reshape(b, s, NUM_HEADS, KEY_SIZE).transpose(0, 2, 1, 3)
    scores = jnp.einsum("bhqk,bhjk->bhqj", q, k,
                        precision=precision) / jnp.sqrt(jnp.float32(KEY_SIZE))
    mask = jnp.triu(jnp.ones((s, s), bool), k=1)
    scores = jnp.where(mask, -jnp.inf, scores)
    attn = jax.nn.softmax(scores, axis=-1)
    ctx = jnp.einsum("bhqj,bhjk->bhqk", attn, v, precision=precision)
    ctx = ctx.transpose(0, 2, 1, 3).reshape(b, s, NUM_HEADS * KEY_SIZE)
    attn_out = lin(ctx, p["wo"], p["bo"])
    x1 = x + attn_out
    h1 = jnp.maximum(lin(x1, p["w1"], p["b1"]), 0.0)
    return x1 + lin(h1, p["w2"], p["b2"])


if __name__ == "__main__":
    key = jax.random.PRNGKey(0)
    kx, kp = jax.random.split(key)
    x = jax.random.normal(kx, (BATCH, SEQ, MODEL_DIM), jnp.float32)
    params = init_params(kp)

    y = jax.block_until_ready(transformer_decoder_layer(x, params))
    y_ref = reference_forward(x, params)

    assert y.shape == (BATCH, SEQ, MODEL_DIM)
    assert jnp.allclose(y, y_ref, atol=2e-3, rtol=2e-3), "mismatch vs JAX reference"

    print("KERNEL_OK")
</pallas_src>

<mosaic_0001>
module attributes {stable_mosaic.version = 11 : i64} {
  func.func @decoder_layer_kernel(%arg0: memref<16x32xf32, #tpu.memory_space<vmem>>, %arg1: memref<16x16xf32, #tpu.memory_space<vmem>>, %arg2: memref<32x96xf32, #tpu.memory_space<vmem>>, %arg3: memref<1x96xf32, #tpu.memory_space<vmem>>, %arg4: memref<32x32xf32, #tpu.memory_space<vmem>>, %arg5: memref<1x32xf32, #tpu.memory_space<vmem>>, %arg6: memref<32x64xf32, #tpu.memory_space<vmem>>, %arg7: memref<1x64xf32, #tpu.memory_space<vmem>>, %arg8: memref<64x32xf32, #tpu.memory_space<vmem>>, %arg9: memref<1x32xf32, #tpu.memory_space<vmem>>, %arg10: memref<16x32xf32, #tpu.memory_space<vmem>>) attributes {dimension_semantics = [], scalar_prefetch = 0 : i64, scratch_operands = 0 : i64, tpu.core_type = #tpu.core_type<tc>} {
    %c0 = arith.constant 0 : index
    %c0_0 = arith.constant 0 : index
    %0 = vector.load %arg0[%c0, %c0_0] : memref<16x32xf32, #tpu.memory_space<vmem>>, vector<16x32xf32>
    %c0_1 = arith.constant 0 : index
    %c0_2 = arith.constant 0 : index
    %1 = vector.load %arg1[%c0_1, %c0_2] : memref<16x16xf32, #tpu.memory_space<vmem>>, vector<16x16xf32>
    %c0_3 = arith.constant 0 : index
    %c0_4 = arith.constant 0 : index
    %2 = vector.load %arg2[%c0_3, %c0_4] : memref<32x96xf32, #tpu.memory_space<vmem>>, vector<32x96xf32>
    %cst = arith.constant dense<0.000000e+00> : vector<16x96xf32>
    %3 = tpu.matmul %0, %2, %cst {dimension_numbers = #tpu.dot_dimension_numbers<[1], [0], [0], [1], [0, 0, 1, 1], [], []>} : vector<16x32xf32>, vector<32x96xf32>, vector<16x96xf32> -> vector<16x96xf32>
    %c0_5 = arith.constant 0 : index
    %c0_6 = arith.constant 0 : index
    %4 = vector.load %arg3[%c0_5, %c0_6] : memref<1x96xf32, #tpu.memory_space<vmem>>, vector<1x96xf32>
    %5 = vector.broadcast %4 : vector<1x96xf32> to vector<16x96xf32>
    %6 = arith.addf %3, %5 : vector<16x96xf32>
    %7 = vector.extract_strided_slice %6 {offsets = [0, 0], sizes = [16, 8], strides = [1, 1]} : vector<16x96xf32> to vector<16x8xf32>
    %8 = vector.extract_strided_slice %6 {offsets = [0, 32], sizes = [16, 8], strides = [1, 1]} : vector<16x96xf32> to vector<16x8xf32>
    %9 = vector.extract_strided_slice %6 {offsets = [0, 64], sizes = [16, 8], strides = [1, 1]} : vector<16x96xf32> to vector<16x8xf32>
    %cst_7 = arith.constant dense<0.000000e+00> : vector<16x16xf32>
    %10 = tpu.matmul %7, %8, %cst_7 {dimension_numbers = #tpu.dot_dimension_numbers<[1], [1], [0], [0], [0, 0, 1, 0], [], []>} : vector<16x8xf32>, vector<16x8xf32>, vector<16x16xf32> -> vector<16x16xf32>
    %11 = arith.addf %10, %1 : vector<16x16xf32>
    %cst_8 = arith.constant dense<0xFF800000> : vector<16xf32>
    %12 = vector.multi_reduction <maximumf>, %11, %cst_8 [1] : vector<16x16xf32> to vector<16xf32>
    %13 = vector.shape_cast %12 : vector<16xf32> to vector<16x1xf32>
    %14 = vector.broadcast %13 : vector<16x1xf32> to vector<16x16xf32>
    %15 = arith.subf %11, %14 : vector<16x16xf32>
    %16 = math.exp %15 : vector<16x16xf32>
    %cst_9 = arith.constant dense<0.000000e+00> : vector<16xf32>
    %17 = vector.multi_reduction <add>, %16, %cst_9 [1] : vector<16x16xf32> to vector<16xf32>
    %18 = vector.shape_cast %17 : vector<16xf32> to vector<16x1xf32>
    %19 = vector.broadcast %18 : vector<16x1xf32> to vector<16x16xf32>
    %20 = arith.divf %16, %19 : vector<16x16xf32>
    %cst_10 = arith.constant dense<0.000000e+00> : vector<16x8xf32>
    %21 = tpu.matmul %20, %9, %cst_10 {dimension_numbers = #tpu.dot_dimension_numbers<[1], [0], [0], [1], [0, 0, 1, 1], [], []>} : vector<16x16xf32>, vector<16x8xf32>, vector<16x8xf32> -> vector<16x8xf32>
    %22 = vector.extract_strided_slice %6 {offsets = [0, 8], sizes = [16, 8], strides = [1, 1]} : vector<16x96xf32> to vector<16x8xf32>
    %23 = vector.extract_strided_slice %6 {offsets = [0, 40], sizes = [16, 8], strides = [1, 1]} : vector<16x96xf32> to vector<16x8xf32>
    %24 = vector.extract_strided_slice %6 {offsets = [0, 72], sizes = [16, 8], strides = [1, 1]} : vector<16x96xf32> to vector<16x8xf32>
    %cst_11 = arith.constant dense<0.000000e+00> : vector<16x16xf32>
    %25 = tpu.matmul %22, %23, %cst_11 {dimension_numbers = #tpu.dot_dimension_numbers<[1], [1], [0], [0], [0, 0, 1, 0], [], []>} : vector<16x8xf32>, vector<16x8xf32>, vector<16x16xf32> -> vector<16x16xf32>
    %26 = arith.addf %25, %1 : vector<16x16xf32>
    %cst_12 = arith.constant dense<0xFF800000> : vector<16xf32>
    %27 = vector.multi_reduction <maximumf>, %26, %cst_12 [1] : vector<16x16xf32> to vector<16xf32>
    %28 = vector.shape_cast %27 : vector<16xf32> to vector<16x1xf32>
    %29 = vector.broadcast %28 : vector<16x1xf32> to vector<16x16xf32>
    %30 = arith.subf %26, %29 : vector<16x16xf32>
    %31 = math.exp %30 : vector<16x16xf32>
    %cst_13 = arith.constant dense<0.000000e+00> : vector<16xf32>
    %32 = vector.multi_reduction <add>, %31, %cst_13 [1] : vector<16x16xf32> to vector<16xf32>
    %33 = vector.shape_cast %32 : vector<16xf32> to vector<16x1xf32>
    %34 = vector.broadcast %33 : vector<16x1xf32> to vector<16x16xf32>
    %35 = arith.divf %31, %34 : vector<16x16xf32>
    %cst_14 = arith.constant dense<0.000000e+00> : vector<16x8xf32>
    %36 = tpu.matmul %35, %24, %cst_14 {dimension_numbers = #tpu.dot_dimension_numbers<[1], [0], [0], [1], [0, 0, 1, 1], [], []>} : vector<16x16xf32>, vector<16x8xf32>, vector<16x8xf32> -> vector<16x8xf32>
    %37 = vector.extract_strided_slice %6 {offsets = [0, 16], sizes = [16, 8], strides = [1, 1]} : vector<16x96xf32> to vector<16x8xf32>
    %38 = vector.extract_strided_slice %6 {offsets = [0, 48], sizes = [16, 8], strides = [1, 1]} : vector<16x96xf32> to vector<16x8xf32>
    %39 = vector.extract_strided_slice %6 {offsets = [0, 80], sizes = [16, 8], strides = [1, 1]} : vector<16x96xf32> to vector<16x8xf32>
    %cst_15 = arith.constant dense<0.000000e+00> : vector<16x16xf32>
    %40 = tpu.matmul %37, %38, %cst_15 {dimension_numbers = #tpu.dot_dimension_numbers<[1], [1], [0], [0], [0, 0, 1, 0], [], []>} : vector<16x8xf32>, vector<16x8xf32>, vector<16x16xf32> -> vector<16x16xf32>
    %41 = arith.addf %40, %1 : vector<16x16xf32>
    %cst_16 = arith.constant dense<0xFF800000> : vector<16xf32>
    %42 = vector.multi_reduction <maximumf>, %41, %cst_16 [1] : vector<16x16xf32> to vector<16xf32>
    %43 = vector.shape_cast %42 : vector<16xf32> to vector<16x1xf32>
    %44 = vector.broadcast %43 : vector<16x1xf32> to vector<16x16xf32>
    %45 = arith.subf %41, %44 : vector<16x16xf32>
    %46 = math.exp %45 : vector<16x16xf32>
    %cst_17 = arith.constant dense<0.000000e+00> : vector<16xf32>
    %47 = vector.multi_reduction <add>, %46, %cst_17 [1] : vector<16x16xf32> to vector<16xf32>
    %48 = vector.shape_cast %47 : vector<16xf32> to vector<16x1xf32>
    %49 = vector.broadcast %48 : vector<16x1xf32> to vector<16x16xf32>
    %50 = arith.divf %46, %49 : vector<16x16xf32>
    %cst_18 = arith.constant dense<0.000000e+00> : vector<16x8xf32>
    %51 = tpu.matmul %50, %39, %cst_18 {dimension_numbers = #tpu.dot_dimension_numbers<[1], [0], [0], [1], [0, 0, 1, 1], [], []>} : vector<16x16xf32>, vector<16x8xf32>, vector<16x8xf32> -> vector<16x8xf32>
    %52 = vector.extract_strided_slice %6 {offsets = [0, 24], sizes = [16, 8], strides = [1, 1]} : vector<16x96xf32> to vector<16x8xf32>
    %53 = vector.extract_strided_slice %6 {offsets = [0, 56], sizes = [16, 8], strides = [1, 1]} : vector<16x96xf32> to vector<16x8xf32>
    %54 = vector.extract_strided_slice %6 {offsets = [0, 88], sizes = [16, 8], strides = [1, 1]} : vector<16x96xf32> to vector<16x8xf32>
    %cst_19 = arith.constant dense<0.000000e+00> : vector<16x16xf32>
    %55 = tpu.matmul %52, %53, %cst_19 {dimension_numbers = #tpu.dot_dimension_numbers<[1], [1], [0], [0], [0, 0, 1, 0], [], []>} : vector<16x8xf32>, vector<16x8xf32>, vector<16x16xf32> -> vector<16x16xf32>
    %56 = arith.addf %55, %1 : vector<16x16xf32>
    %cst_20 = arith.constant dense<0xFF800000> : vector<16xf32>
    %57 = vector.multi_reduction <maximumf>, %56, %cst_20 [1] : vector<16x16xf32> to vector<16xf32>
    %58 = vector.shape_cast %57 : vector<16xf32> to vector<16x1xf32>
    %59 = vector.broadcast %58 : vector<16x1xf32> to vector<16x16xf32>
    %60 = arith.subf %56, %59 : vector<16x16xf32>
    %61 = math.exp %60 : vector<16x16xf32>
    %cst_21 = arith.constant dense<0.000000e+00> : vector<16xf32>
    %62 = vector.multi_reduction <add>, %61, %cst_21 [1] : vector<16x16xf32> to vector<16xf32>
    %63 = vector.shape_cast %62 : vector<16xf32> to vector<16x1xf32>
    %64 = vector.broadcast %63 : vector<16x1xf32> to vector<16x16xf32>
    %65 = arith.divf %61, %64 : vector<16x16xf32>
    %cst_22 = arith.constant dense<0.000000e+00> : vector<16x8xf32>
    %66 = tpu.matmul %65, %54, %cst_22 {dimension_numbers = #tpu.dot_dimension_numbers<[1], [0], [0], [1], [0, 0, 1, 1], [], []>} : vector<16x16xf32>, vector<16x8xf32>, vector<16x8xf32> -> vector<16x8xf32>
    %67 = tpu.concatenate %21, %36, %51, %66 in 1 : vector<16x8xf32>, vector<16x8xf32>, vector<16x8xf32>, vector<16x8xf32> -> vector<16x32xf32>
    %c0_23 = arith.constant 0 : index
    %c0_24 = arith.constant 0 : index
    %68 = vector.load %arg4[%c0_23, %c0_24] : memref<32x32xf32, #tpu.memory_space<vmem>>, vector<32x32xf32>
    %cst_25 = arith.constant dense<0.000000e+00> : vector<16x32xf32>
    %69 = tpu.matmul %67, %68, %cst_25 {dimension_numbers = #tpu.dot_dimension_numbers<[1], [0], [0], [1], [0, 0, 1, 1], [], []>} : vector<16x32xf32>, vector<32x32xf32>, vector<16x32xf32> -> vector<16x32xf32>
    %c0_26 = arith.constant 0 : index
    %c0_27 = arith.constant 0 : index
    %70 = vector.load %arg5[%c0_26, %c0_27] : memref<1x32xf32, #tpu.memory_space<vmem>>, vector<1x32xf32>
    %71 = vector.broadcast %70 : vector<1x32xf32> to vector<16x32xf32>
    %72 = arith.addf %69, %71 : vector<16x32xf32>
    %73 = arith.addf %0, %72 : vector<16x32xf32>
    %c0_28 = arith.constant 0 : index
    %c0_29 = arith.constant 0 : index
    %74 = vector.load %arg6[%c0_28, %c0_29] : memref<32x64xf32, #tpu.memory_space<vmem>>, vector<32x64xf32>
    %cst_30 = arith.constant dense<0.000000e+00> : vector<16x64xf32>
    %75 = tpu.matmul %73, %74, %cst_30 {dimension_numbers = #tpu.dot_dimension_numbers<[1], [0], [0], [1], [0, 0, 1, 1], [], []>} : vector<16x32xf32>, vector<32x64xf32>, vector<16x64xf32> -> vector<16x64xf32>
    %c0_31 = arith.constant 0 : index
    %c0_32 = arith.constant 0 : index
    %76 = vector.load %arg7[%c0_31, %c0_32] : memref<1x64xf32, #tpu.memory_space<vmem>>, vector<1x64xf32>
    %77 = vector.broadcast %76 : vector<1x64xf32> to vector<16x64xf32>
    %78 = arith.addf %75, %77 : vector<16x64xf32>
    %cst_33 = arith.constant 0.000000e+00 : f32
    %79 = vector.broadcast %cst_33 : f32 to vector<16x64xf32>
    %80 = arith.maximumf %78, %79 : vector<16x64xf32>
    %c0_34 = arith.constant 0 : index
    %c0_35 = arith.constant 0 : index
    %81 = vector.load %arg8[%c0_34, %c0_35] : memref<64x32xf32, #tpu.memory_space<vmem>>, vector<64x32xf32>
    %cst_36 = arith.constant dense<0.000000e+00> : vector<16x32xf32>
    %82 = tpu.matmul %80, %81, %cst_36 {dimension_numbers = #tpu.dot_dimension_numbers<[1], [0], [0], [1], [0, 0, 1, 1], [], []>} : vector<16x64xf32>, vector<64x32xf32>, vector<16x32xf32> -> vector<16x32xf32>
    %c0_37 = arith.constant 0 : index
    %c0_38 = arith.constant 0 : index
    %83 = vector.load %arg9[%c0_37, %c0_38] : memref<1x32xf32, #tpu.memory_space<vmem>>, vector<1x32xf32>
    %84 = vector.broadcast %83 : vector<1x32xf32> to vector<16x32xf32>
    %85 = arith.addf %82, %84 : vector<16x32xf32>
    %86 = arith.addf %73, %85 : vector<16x32xf32>
    %c0_39 = arith.constant 0 : index
    %c0_40 = arith.constant 0 : index
    %87 = vector.load %arg10[%c0_39, %c0_40] : memref<16x32xf32, #tpu.memory_space<vmem>>, vector<16x32xf32>
    tpu.vector_store %arg10[%c0_39, %c0_40], %86 {strides = array<i32>} : memref<16x32xf32, #tpu.memory_space<vmem>>, vector<16x32xf32>,
    return
  }
}

</mosaic_0001>

<bundles_post_ra>
// kernel: tpu_custom_call.1
= control target key start
LH: loop header
LB: loop body
LE: loop exit
PB: predicated region body
PF: predicated region fallthrough
CT: control target
= control target key end

     0   :  { %15 = vsyncpa [#allocation3], 0  ;;  %s1266_s0 = inlined_call_operand.hbm [shape: f32[16,32], index: 0, kind: input, shape index: {}]   ;;  %s1267_s1 = inlined_call_operand.hbm [shape: f32[16,16], index: 1, kind: input, shape index: {}]   ;;  %s1268_s2 = inlined_call_operand.vmem [shape: f32[32,96], index: 2, kind: input, shape index: {}]   ;;  %s1269_s3 = inlined_call_operand.vmem [shape: f32[1,96], index: 3, kind: input, shape index: {}]   ;;  %s1270_s4 = inlined_call_operand.vmem [shape: f32[32,32], index: 4, kind: input, shape index: {}]   ;;  %s1271_s5 = inlined_call_operand.vmem [shape: f32[1,32], index: 5, kind: input, shape index: {}]   ;;  %s1272_s6 = inlined_call_operand.vmem [shape: f32[32,64], index: 6, kind: input, shape index: {}]   ;;  %s1273_s7 = inlined_call_operand.vmem [shape: f32[1,64], index: 7, kind: input, shape index: {}]   ;;  %s1274_s8 = inlined_call_operand.vmem [shape: f32[64,32], index: 8, kind: input, shape index: {}]   ;;  %s1275_s9 = inlined_call_operand.vmem [shape: f32[1,32], index: 9, kind: input, shape index: {}]   ;;  %s1276_s10 = inlined_call_operand.hbm [shape: f32[16,32], index: 10, kind: output, shape index: {}]  }
   0x1   :  { %16 = vsyncpa [#allocation6], 0 }
   0x2   :  { %17 = vsyncpa [#allocation4], 0  ;;  %s22_s15 = sshll.u32 %s1266_s0, 4  ;;  %s957_s16 = smov [#allocation2]   ;;  %s23_s15 = int_to_ptr.hbm [resolvable:$true] %s22_s15 }
   0x3   :  { %s24_s17 = sshll.u32 %s957_s16, 4  ;;  %s35_s20 = sshll.u32 %s1267_s1, 4  ;;  %s25_s17 = int_to_ptr.vmem [resolvable:$true] %s24_s17  ;;  %s36_s20 = int_to_ptr.hbm [resolvable:$true] %s35_s20 }
   0x4   :  { %s958_s21 = smov 128   ;;  %s959_s22 = smov 8  }
   0x5   :  { %30 = dma.hbm_to_vmem [thread:$0]  %s23_s15, 256, %s25_s17, [#allocation3], %s958_s21, %s958_s21, %s959_s22  }
   0x6   :  { %s960_s23 = smov [#allocation5]  }
   0x7   :  { %s37_s24 = sshll.u32 %s960_s23, 4  ;;  %s38_s24 = int_to_ptr.vmem [resolvable:$true] %s37_s24 }
   0x8   :  { %43 = dma.hbm_to_vmem [thread:$0]  %s36_s20, 256, %s38_s24, [#allocation6], %s958_s21, %s958_s21, %s959_s22  }
   0x9   :  { %951 = dma.done.wait [#allocation3], 256  }
   0xa   :  { %952 = vsyncadd [#allocation3], 4294967040 }
   0xb   :  { %953 = dma.done.wait [#allocation6], 256  }
   0xc   :  { %954 = vsyncadd [#allocation6], 4294967040  ;;  %v75_v0 = vld [vmem:[%s1268_s2 + $0x18] sm:$0xff]  ;;  %v74_v1 = vld [vmem:[%s1268_s2 + $0x10] sm:$0xff]  ;;  %vm80_vm0 = vcmask 261120   ;;  %s962_s13 = smov 88  }
   0xd   :  { %99 = vmatpush.msra.mxu0 %v75_v0  ;;  %v73_v2 = vld [vmem:[%s1268_s2 + $0x8] sm:$0xff]  ;;  %v72_v3 = vld [vmem:[%s1268_s2] sm:$0xff]  ;;  %s961_s2 = smov 120   ;;  %s963_s14 = smov 96   ;;  %vm116_vm1 = vcmask 64512   ;;  %v70_v25 = vld [vmem:[#allocation5] sm:$0xff] }
   0xe   :  { %v1054_v4 = vld [vmem:[#allocation2] sm:$0xff]  ;;  %v1058_v5 = vld [vmem:[#allocation2 + $0x8] sm:$0xff]  ;;  %s965_s15 = smov 72   ;;  %s966_s16 = smov 80   ;;  %vm148_vm2 = vcmask 130048   ;;  %v71_v30 = vld [vmem:[#allocation5 + $0x8] sm:$0xff] }
   0xf   :  { %100 = vmatpush.msra.mxu0 %v74_v1  ;;  %v843_v6 = vld [vmem:[%s1269_s3] ss:$0 sm:$0xff]  ;;  %s964_s3 = smov 104   ;;  %s967_s17 = smov 112  }
  0x10   :  { %s968_s18 = smov 56   ;;  %s969_s19 = smov 64  }
  0x11   :  { %101 = vmatpush.msra.mxu0 %v73_v2  ;;  %s970_s20 = smov 48   ;;  %s971_s23 = smov 40  }
  0x12   :  { %s972_s24 = smov 16   ;;  %s973_s0 = smov 24  }
  0x13   :  { %102 = vmatpush.msra.mxu0 %v72_v3 }
  0x14   :  { %773 = vmatmul.msk.f32.vlgmr.msra.gmra.mxu0 %vm80_vm0, %v1054_v4 }
  0x1c   :  { %774 = vmatmul.msk.f32.gmra.mxu0 %vm80_vm0, %v1058_v5 }
  0x91   :  { %v104_v7 = vpop.f32.mrf.mxu0 }
  0x92   :  { %v1065_v8 = vadd.f32 %v843_v6, %v104_v7 }
  0x94   :  { %232 = vrot.lane.b32.xlu2 %v1065_v8, %s961_s2 }
  0x99   :  { %v107_v9 = vpop.f32.mrf.mxu0 }
  0x9a   :  { %v1068_v10 = vadd.f32 %v843_v6, %v107_v9 }
  0x9c   :  { %238 = vrot.lane.b32.xlu1 %v1068_v10, %s962_s13  ;;  %114 = vrot.lane.b32.xlu0 %v1068_v10, %s963_s14  ;;  %v1114_v51 = vpack.i.bf16 %v1065_v8, %v1068_v10 }
  0x9d   :  { %234 = vrot.lane.b32.xlu2 %v1068_v10, %s961_s2 }
  0xa4   :  { %236 = vrot.lane.b32.xlu1 %v1065_v8, %s962_s13  ;;  %112 = vrot.lane.b32.xlu0 %v1065_v8, %s963_s14 }
  0xa5   :  { %476 = vrot.lane.b32.xlu2 %v1065_v8, %s964_s3 }
  0xac   :  { %480 = vrot.lane.b32.xlu1 %v1065_v8, %s965_s15  ;;  %482 = vrot.lane.b32.xlu0 %v1068_v10, %s965_s15 }
  0xad   :  { %478 = vrot.lane.b32.xlu2 %v1068_v10, %s964_s3 }
  0xb4   :  { %358 = vrot.lane.b32.xlu1 %v1065_v8, %s966_s16  ;;  %360 = vrot.lane.b32.xlu0 %v1068_v10, %s966_s16  ;;  %s759_s16 = sshll.u32 %s1276_s10, 4  ;;  %s760_s16 = int_to_ptr.hbm [resolvable:$true] %s759_s16 }
  0xbc   :  { %356 = vrot.lane.b32.xlu1 %v1068_v10, %s967_s17  ;;  %354 = vrot.lane.b32.xlu0 %v1065_v8, %s967_s17 }
  0xee   :  { %v233_v13 = vpop.permute.xlu2 %232 }
  0xf7   :  { %v235_v16 = vpop.permute.xlu2 %234 }
  0xff   :  { %v477_v20 = vpop.permute.xlu2 %476 }
 0x107   :  { %v479_v23 = vpop.permute.xlu2 %478 }
 0x10e   :  { %v239_v11 = vpop.permute.xlu1 %238  ;;  %v115_v12 = vpop.permute.xlu0 %114 }
 0x10f   :  { %775 = vmatpush.xpose.msk.msra.mxu1 %vm116_vm1, %v115_v12  ;;  %781 = vmatpush.xpose.msk.msra.mxu3 %vm116_vm1, %v239_v11 }
 0x116   :  { %v237_v14 = vpop.permute.xlu1 %236  ;;  %v113_v15 = vpop.permute.xlu0 %112 }
 0x117   :  { %776 = vmatpush.xpose.msk.msra.mxu1 %vm116_vm1, %v113_v15  ;;  %782 = vmatpush.xpose.msk.msra.mxu3 %vm116_vm1, %v237_v14 }
 0x11a   :  { %777 = vmatmul.msk.f32.vlgmr.msra.gmra.mxu1 %vm116_vm1, %v1065_v8  ;;  %783 = vmatmul.msk.f32.vlgmr.msra.gmra.mxu3 %vm116_vm1, %v233_v13 }
 0x11e   :  { %v483_v17 = vpop.permute.xlu0 %482  ;;  %v481_v18 = vpop.permute.xlu1 %480 }
 0x11f   :  { %793 = vmatpush.xpose.msk.msrb.mxu3 %vm116_vm1, %v483_v17 }
 0x122   :  { %778 = vmatmul.msk.f32.gmra.mxu1 %vm116_vm1, %v1068_v10  ;;  %784 = vmatmul.msk.f32.gmra.mxu3 %vm116_vm1, %v235_v16 }
 0x123   :  { %794 = vmatpush.xpose.msk.msrb.mxu3 %vm116_vm1, %v481_v18 }
 0x126   :  { %v361_v19 = vpop.permute.xlu0 %360  ;;  %v359_v21 = vpop.permute.xlu1 %358 }
 0x127   :  { %787 = vmatpush.xpose.msk.msrb.mxu0 %vm116_vm1, %v361_v19 }
 0x12a   :  { %795 = vmatmul.msk.f32.vlgmr.msrb.gmra.mxu3 %vm116_vm1, %v477_v20 }
 0x12b   :  { %788 = vmatpush.xpose.msk.msrb.mxu0 %vm116_vm1, %v359_v21 }
 0x12e   :  { %v355_v22 = vpop.permute.xlu0 %354  ;;  %v357_v24 = vpop.permute.xlu1 %356 }
 0x12f   :  { %789 = vmatmul.msk.f32.vlgmr.msrb.gmra.mxu0 %vm116_vm1, %v355_v22 }
 0x132   :  { %796 = vmatmul.msk.f32.gmra.mxu3 %vm116_vm1, %v479_v23 }
 0x137   :  { %790 = vmatmul.msk.f32.gmra.mxu0 %vm116_vm1, %v357_v24 }
 0x197   :  { %v142_v26 = vpop.f32.mrf.mxu1 }
 0x198   :  { %v143_v27 = vadd.f32 %v142_v26, %v70_v25 }
 0x19a   :  { %v149_v28 = vsel %vm148_vm2, %v143_v27, -inf }
 0x19b   :  { %150 = vmax.xlane.f32.xlu2 %v149_v28 }
 0x19d   :  { %v265_v29 = vpop.f32.mrf.mxu3 }
 0x19e   :  { %v266_v31 = vadd.f32 %v265_v29, %v70_v25 }
 0x19f   :  { %v145_v32 = vpop.f32.mrf.mxu1 }
 0x1a0   :  { %v146_v33 = vadd.f32 %v145_v32, %v71_v30  ;;  %v271_v34 = vsel %vm148_vm2, %v266_v31, -inf }
 0x1a1   :  { %272 = vmax.xlane.f32.xlu1 %v271_v34 }
 0x1a2   :  { %v152_v35 = vsel %vm148_vm2, %v146_v33, -inf }
 0x1a3   :  { %153 = vmax.xlane.f32.xlu0 %v152_v35 }
 0x1a5   :  { %v268_v36 = vpop.f32.mrf.mxu3 }
 0x1a6   :  { %v269_v47 = vadd.f32 %v268_v36, %v71_v30 }
 0x1a8   :  { %v274_v48 = vsel %vm148_vm2, %v269_v47, -inf }
 0x1ac   :  { %v387_v37 = vpop.f32.mrf.mxu0 }
 0x1ad   :  { %v388_v38 = vadd.f32 %v387_v37, %v70_v25  ;;  %v509_v39 = vpop.f32.mrf.mxu3 }
 0x1ae   :  { %v510_v49 = vadd.f32 %v509_v39, %v70_v25 }
 0x1af   :  { %v393_v40 = vsel %vm148_vm2, %v388_v38, -inf }
 0x1b0   :  { %394 = vmax.xlane.f32.xlu0 %v393_v40  ;;  %v515_v50 = vsel %vm148_vm2, %v510_v49, -inf }
 0x1b4   :  { %v390_v41 = vpop.f32.mrf.mxu0 }
 0x1b5   :  { %v391_v42 = vadd.f32 %v390_v41, %v71_v30  ;;  %v512_v43 = vpop.f32.mrf.mxu3 }
 0x1b6   :  { %v1105_v44 = vadd.f32 %v512_v43, %v71_v30 }
 0x1b7   :  { %v396_v45 = vsel %vm148_vm2, %v391_v42, -inf }
 0x1b8   :  { %397 = vmax.xlane.f32.xlu2 %v396_v45  ;;  %v518_v46 = vsel %vm148_vm2, %v1105_v44, -inf }
 0x1b9   :  { %519 = vmax.xlane.f32.xlu1 %v518_v46 }
 0x1c0   :  { %275 = vmax.xlane.f32.xlu2 %v274_v48 }
 0x1c8   :  { %516 = vmax.xlane.f32.xlu2 %v515_v50 }
 0x1d2   :  { %829 = vrot.lane.b32.xlu1 %v1114_v51, %s968_s18 }
 0x20e   :  { %v151_v52 = vpop.xlane.xlu2 %150 }
 0x20f   :  { %v155_v53 = vsub.f32 %v143_v27, %v151_v52 }
 0x211   :  { %v157_v54 = vmul.f32 1.442695, %v155_v53 }
 0x213   :  { %847 = vpow2.f32 %v157_v54 }
 0x214   :  { %v273_v62 = vpop.xlane.xlu1 %272 }
 0x215   :  { %v277_v1 = vsub.f32 %v266_v31, %v273_v62 }
 0x216   :  { %v154_v55 = vpop.xlane.xlu0 %153 }
 0x217   :  { %v156_v56 = vsub.f32 %v146_v33, %v154_v55  ;;  %v279_v3 = vmul.f32 1.442695, %v277_v1 }
 0x219   :  { %v1117_v57 = vpop.eup %847  ;;  %v159_v58 = vmul.f32 1.442695, %v156_v56 }
 0x21a   :  { %v161_v59 = vsel %vm148_vm2, %v1117_v57, 0.0 }
 0x21b   :  { %849 = vpow2.f32 %v159_v58  ;;  %162 = vadd.xlane.f32.xlu0 %v161_v59 }
 0x221   :  { %v1121_v60 = vpop.eup %849 }
 0x222   :  { %v164_v61 = vsel %vm148_vm2, %v1121_v60, 0.0 }
 0x223   :  { %165 = vadd.xlane.f32.xlu1 %v164_v61  ;;  %v395_v63 = vpop.xlane.xlu0 %394 }
 0x224   :  { %v399_v0 = vsub.f32 %v388_v38, %v395_v63 }
 0x226   :  { %v401_v2 = vmul.f32 1.442695, %v399_v0 }
 0x228   :  { %851 = vpow2.f32 %v401_v2 }
 0x229   :  { %853 = vpow2.f32 %v279_v3 }
 0x22b   :  { %v398_v6 = vpop.xlane.xlu2 %397 }
 0x22c   :  { %v400_v17 = vsub.f32 %v391_v42, %v398_v6  ;;  %v520_v21 = vpop.xlane.xlu1 %519 }
 0x22d   :  { %v522_v23 = vsub.f32 %v1105_v44, %v520_v21 }
 0x22e   :  { %v1125_v7 = vpop.eup %851  ;;  %v403_v20 = vmul.f32 1.442695, %v400_v17 }
 0x22f   :  { %824 = vrot.lane.b32.xlu0 %v1114_v51, %s969_s19  ;;  %v405_v8 = vsel %vm148_vm2, %v1125_v7, 0.0  ;;  %v1130_v10 = vpop.eup %853  ;;  %v525_v25 = vmul.f32 1.442695, %v522_v23 }
 0x230   :  { %406 = vadd.xlane.f32.xlu2 %v405_v8  ;;  %v283_v13 = vsel %vm148_vm2, %v1130_v10, 0.0 }
 0x233   :  { %v276_v9 = vpop.xlane.xlu2 %275 }
 0x234   :  { %v278_v11 = vsub.f32 %v269_v47, %v276_v9 }
 0x236   :  { %v281_v12 = vmul.f32 1.442695, %v278_v11 }
 0x238   :  { %855 = vpow2.f32 %v281_v12  ;;  %284 = vadd.xlane.f32.xlu2 %v283_v13 }
 0x23b   :  { %v517_v14 = vpop.xlane.xlu2 %516 }
 0x23c   :  { %v521_v15 = vsub.f32 %v510_v49, %v517_v14 }
 0x23e   :  { %v1134_v16 = vpop.eup %855  ;;  %v523_v18 = vmul.f32 1.442695, %v521_v15 }
 0x23f   :  { %v286_v19 = vsel %vm148_vm2, %v1134_v16, 0.0 }
 0x240   :  { %857 = vpow2.f32 %v523_v18  ;;  %287 = vadd.xlane.f32.xlu1 %v286_v19 }
 0x241   :  { %859 = vpow2.f32 %v403_v20 }
 0x242   :  { %861 = vpow2.f32 %v525_v25 }
 0x244   :  { %v830_v30 = vpop.permute.xlu1 %829 }
 0x245   :  { %v831_v55 = vunpack.i.l.bf16 %v830_v30  ;;  %v832_v59 = vunpack.i.h.bf16 %v830_v30 }
 0x246   :  { %v1138_v22 = vpop.eup %857 }
 0x247   :  { %v527_v24 = vsel %vm148_vm2, %v1138_v22, 0.0  ;;  %v1143_v26 = vpop.eup %859 }
 0x248   :  { %528 = vadd.xlane.f32.xlu2 %v527_v24  ;;  %v408_v27 = vsel %vm148_vm2, %v1143_v26, 0.0  ;;  %v1147_v28 = vpop.eup %861 }
 0x249   :  { %v530_v29 = vsel %vm148_vm2, %v1147_v28, 0.0 }
 0x250   :  { %409 = vadd.xlane.f32.xlu2 %v408_v27 }
 0x259   :  { %531 = vadd.xlane.f32.xlu0 %v530_v29  ;;  %839 = vrot.lane.b32.xlu1 %v1114_v51, %s970_s20 }
 0x268   :  { %834 = vrot.lane.b32.xlu2 %v1114_v51, %s971_s23 }
 0x28e   :  { %v163_v31 = vpop.xlane.xlu0 %162 }
 0x28f   :  { %863 = vrcp.f32 %v163_v31  ;;  %v178_v37 = vand.u32 2147483648, %v163_v31  ;;  %vm172_vm4 = vweird.f32 %v163_v31  ;;  %v176_v40 = vand.u32 2147483647, %v163_v31 }
 0x291   :  { %v179_v43 = vor.u32 1.1754944e-38, %v178_v37  ;;  %vm177_vm6 = vcmp.eq.f32.partialorder %v176_v40, 8.507059e+37 }
 0x295   :  { %v864_v32 = vpop.eup %863 }
 0x296   :  { %v168_v33 = vmul.f32 %v864_v32, %v163_v31  ;;  %v166_v34 = vpop.xlane.xlu1 %165  ;;  %vm173_vm3 = vweird.f32 %v864_v32 }
 0x297   :  { %865 = vrcp.f32 %v166_v34  ;;  %vm174_vm5 = vmor %vm172_vm4, %vm173_vm3  ;;  %v193_v50 = vand.u32 2147483648, %v166_v34  ;;  %vm187_vm8 = vweird.f32 %v166_v34  ;;  %v191_v54 = vand.u32 2147483647, %v166_v34 }
 0x298   :  { %v169_v35 = vsub.f32 1.0, %v168_v33 }
 0x299   :  { %v194_v58 = vor.u32 1.1754944e-38, %v193_v50  ;;  %vm192_vm10 = vcmp.eq.f32.partialorder %v191_v54, 8.507059e+37 }
 0x29a   :  { %v170_v36 = vmul.f32 %v864_v32, %v169_v35 }
 0x29c   :  { %v171_v38 = vadd.f32 %v864_v32, %v170_v36 }
 0x29d   :  { %v866_v39 = vpop.eup %865 }
 0x29e   :  { %v183_v41 = vmul.f32 %v866_v39, %v166_v34  ;;  %v175_v42 = vsel %vm174_vm5, %v864_v32, %v171_v38  ;;  %vm188_vm7 = vweird.f32 %v866_v39 }
 0x29f   :  { %v180_v48 = vsel %vm177_vm6, %v179_v43, %v175_v42  ;;  %vm189_vm9 = vmor %vm187_vm8, %vm188_vm7 }
 0x2a0   :  { %v184_v44 = vsub.f32 1.0, %v183_v41  ;;  %v181_v52 = vmul.f32 %v1117_v57, %v180_v48 }
 0x2a1   :  { %v825_v45 = vpop.permute.xlu0 %824 }
 0x2a2   :  { %v185_v46 = vmul.f32 %v866_v39, %v184_v44  ;;  %v826_v47 = vunpack.i.l.bf16 %v825_v45  ;;  %v827_v51 = vunpack.i.h.bf16 %v825_v45 }
 0x2a3   :  { %v1153_v49 = vpop.xlane.xlu2 %406 }
 0x2a4   :  { %223 = vmatpush.msra.mxu2 %v826_v47  ;;  %v186_v53 = vadd.f32 %v866_v39, %v185_v46  ;;  %v422_v36 = vand.u32 2147483648, %v1153_v49  ;;  %vm416_vm7 = vweird.f32 %v1153_v49 }
 0x2a6   :  { %224 = vmatpush.msra.mxu2 %v827_v51  ;;  %v190_v56 = vsel %vm189_vm9, %v866_v39, %v186_v53  ;;  %v420_v39 = vand.u32 2147483647, %v1153_v49  ;;  %v423_v45 = vor.u32 1.1754944e-38, %v422_v36 }
 0x2a7   :  { %779 = vmatmul.msk.f32.vlgmr.msra.gmra.mxu2 %vm148_vm2, %v181_v52  ;;  %v195_v61 = vsel %vm192_vm10, %v194_v58, %v190_v56 }
 0x2a8   :  { %345 = vmatpush.msrb.mxu2 %v831_v55  ;;  %v196_v63 = vmul.f32 %v1121_v60, %v195_v61 }
 0x2aa   :  { %346 = vmatpush.msrb.mxu2 %v832_v59 }
 0x2ab   :  { %v285_v62 = vpop.xlane.xlu2 %284 }
 0x2ac   :  { %867 = vrcp.f32 %v285_v62  ;;  %v300_v8 = vand.u32 2147483648, %v285_v62  ;;  %v298_v11 = vand.u32 2147483647, %v285_v62  ;;  %vm294_vm12 = vweird.f32 %v285_v62 }
 0x2ad   :  { %869 = vrcp.f32 %v1153_v49 }
 0x2ae   :  { %v301_v13 = vor.u32 1.1754944e-38, %v300_v8  ;;  %vm299_vm14 = vcmp.eq.f32.partialorder %v298_v11, 8.507059e+37 }
 0x2af   :  { %780 = vmatmul.msk.f32.gmra.mxu2 %vm148_vm2, %v196_v63 }
 0x2b2   :  { %v868_v57 = vpop.eup %867 }
 0x2b3   :  { %v290_v0 = vmul.f32 %v868_v57, %v285_v62  ;;  %v288_v1 = vpop.xlane.xlu1 %287  ;;  %v1160_v2 = vpop.eup %869  ;;  %vm295_vm11 = vweird.f32 %v868_v57 }
 0x2b4   :  { %871 = vrcp.f32 %v288_v1  ;;  %v412_v9 = vmul.f32 %v1160_v2, %v1153_v49  ;;  %vm296_vm13 = vmor %vm294_vm12, %vm295_vm11  ;;  %v315_v21 = vand.u32 2147483648, %v288_v1  ;;  %v313_v25 = vand.u32 2147483647, %v288_v1 }
 0x2b5   :  { %v291_v3 = vsub.f32 1.0, %v290_v0  ;;  %vm309_vm3 = vweird.f32 %v288_v1  ;;  %vm417_vm6 = vweird.f32 %v1160_v2  ;;  %vm421_vm11 = vcmp.eq.f32.partialorder %v420_v39, 8.507059e+37 }
 0x2b6   :  { %v413_v18 = vsub.f32 1.0, %v412_v9  ;;  %v316_v31 = vor.u32 1.1754944e-38, %v315_v21  ;;  %vm314_vm5 = vcmp.eq.f32.partialorder %v313_v25, 8.507059e+37  ;;  %vm1173_vm8 = vmor %vm416_vm7, %vm417_vm6 }
 0x2b7   :  { %v292_v6 = vmul.f32 %v868_v57, %v291_v3 }
 0x2b8   :  { %v414_v27 = vmul.f32 %v1160_v2, %v413_v18 }
 0x2b9   :  { %v293_v12 = vadd.f32 %v868_v57, %v292_v6 }
 0x2ba   :  { %v872_v60 = vpop.eup %871  ;;  %v415_v35 = vadd.f32 %v1160_v2, %v414_v27 }
 0x2bb   :  { %v305_v14 = vmul.f32 %v872_v60, %v288_v1  ;;  %v529_v15 = vpop.xlane.xlu2 %528  ;;  %v297_v17 = vsel %vm296_vm13, %v868_v57, %v293_v12  ;;  %vm310_vm15 = vweird.f32 %v872_v60 }
 0x2bc   :  { %873 = vrcp.f32 %v529_v15  ;;  %v302_v20 = vsel %vm299_vm14, %v301_v13, %v297_v17  ;;  %vm311_vm4 = vmor %vm309_vm3, %vm310_vm15  ;;  %v544_v40 = vand.u32 2147483648, %v529_v15  ;;  %v542_v43 = vand.u32 2147483647, %v529_v15 }
 0x2bd   :  { %v306_v19 = vsub.f32 1.0, %v305_v14  ;;  %v303_v23 = vmul.f32 %v1130_v10, %v302_v20  ;;  %v419_v44 = vsel %vm1173_vm8, %v1160_v2, %v415_v35  ;;  %vm538_vm10 = vweird.f32 %v529_v15 }
 0x2be   :  { %v545_v47 = vor.u32 1.1754944e-38, %v544_v40  ;;  %vm543_vm13 = vcmp.eq.f32.partialorder %v542_v43, 8.507059e+37  ;;  %v424_v52 = vsel %vm421_vm11, %v423_v45, %v419_v44  ;;  %v670_v45 = vld [vmem:[%s1272_s6 + $0x10] sm:$0xff] }
 0x2bf   :  { %v307_v24 = vmul.f32 %v872_v60, %v306_v19  ;;  %785 = vmatmul.msk.f32.vlgmr.msrb.gmra.mxu2 %vm148_vm2, %v303_v23  ;;  %v425_v63 = vmul.f32 %v1125_v7, %v424_v52  ;;  %v844_v52 = vld [vmem:[%s1271_s5] ss:$0 sm:$0xff] }
 0x2c1   :  { %v308_v29 = vadd.f32 %v872_v60, %v307_v24 }
 0x2c2   :  { %v874_v30 = vpop.eup %873 }
 0x2c3   :  { %v534_v32 = vmul.f32 %v874_v30, %v529_v15  ;;  %v410_v33 = vpop.xlane.xlu2 %409  ;;  %v312_v34 = vsel %vm311_vm4, %v872_v60, %v308_v29  ;;  %vm539_vm9 = vweird.f32 %v874_v30 }
 0x2c4   :  { %875 = vrcp.f32 %v410_v33  ;;  %v317_v10 = vsel %vm314_vm5, %v316_v31, %v312_v34  ;;  %vm540_vm12 = vmor %vm538_vm10, %vm539_vm9  ;;  %v437_v59 = vand.u32 2147483648, %v410_v33  ;;  %v435_v1 = vand.u32 2147483647, %v410_v33  ;;  %v630_v31 = vld [vmem:[%s1270_s4 + $0x8] sm:$0xff] }
 0x2c5   :  { %v535_v37 = vsub.f32 1.0, %v534_v32  ;;  %v318_v38 = vmul.f32 %v1134_v16, %v317_v10  ;;  %vm431_vm15 = vweird.f32 %v410_v33  ;;  %v629_v32 = vld [vmem:[%s1270_s4] sm:$0xff]  ;;  %vm626_vm9 = vcmask 195584  }
 0x2c6   :  { %v438_v3 = vor.u32 1.1754944e-38, %v437_v59  ;;  %vm436_vm4 = vcmp.eq.f32.partialorder %v435_v1, 8.507059e+37 }
 0x2c7   :  { %v536_v42 = vmul.f32 %v874_v30, %v535_v37  ;;  %786 = vmatmul.msk.f32.gmra.mxu2 %vm148_vm2, %v318_v38 }
 0x2c9   :  { %v537_v16 = vadd.f32 %v874_v30, %v536_v42 }
 0x2ca   :  { %v876_v46 = vpop.eup %875 }
 0x2cb   :  { %v541_v48 = vsel %vm540_vm12, %v874_v30, %v537_v16  ;;  %v427_v49 = vmul.f32 %v876_v46, %v410_v33  ;;  %v840_v50 = vpop.permute.xlu1 %839  ;;  %v835_v51 = vpop.permute.xlu2 %834  ;;  %vm432_vm14 = vweird.f32 %v876_v46  ;;  %v631_v30 = vld [vmem:[%s1270_s4 + $0x10] sm:$0xff]  ;;  %v671_v33 = vld [vmem:[%s1272_s6 + $0x18] sm:$0xff]  ;;  %v669_v16 = vld [vmem:[%s1272_s6 + $0x8] sm:$0xff] }
 0x2cc   :  { %v546_v53 = vsel %vm543_vm13, %v545_v47, %v541_v48  ;;  %v836_v54 = vunpack.i.l.bf16 %v835_v51  ;;  %v532_v55 = vpop.xlane.xlu0 %531  ;;  %v841_v56 = vunpack.i.l.bf16 %v840_v50  ;;  %v837_v61 = vunpack.i.h.bf16 %v835_v51  ;;  %vm433_vm3 = vmor %vm431_vm15, %vm432_vm14  ;;  %v714_v47 = vld [vmem:[%s1274_s8 + $0x38] sm:$0xff]  ;;  %v713_v48 = vld [vmem:[%s1274_s8 + $0x30] sm:$0xff] }
 0x2cd   :  { %v428_v58 = vsub.f32 1.0, %v427_v49  ;;  %877 = vrcp.f32 %v532_v55  ;;  %v842_v62 = vunpack.i.h.bf16 %v840_v50  ;;  %v547_v0 = vmul.f32 %v1138_v22, %v546_v53  ;;  %734 = vmatpush.msra.mxu3 %v714_v47  ;;  %v712_v49 = vld [vmem:[%s1274_s8 + $0x28] sm:$0xff]  ;;  %v711_v50 = vld [vmem:[%s1274_s8 + $0x20] sm:$0xff]  ;;  %v710_v51 = vld [vmem:[%s1274_s8 + $0x18] sm:$0xff] }
 0x2ce   :  { %467 = vmatpush.msrb.mxu1 %v841_v56  ;;  %589 = vmatpush.msra.mxu2 %v836_v54  ;;  %v559_v12 = vand.u32 2147483648, %v532_v55  ;;  %v557_v13 = vand.u32 2147483647, %v532_v55  ;;  %vm553_vm6 = vweird.f32 %v532_v55 }
 0x2cf   :  { %v429_v57 = vmul.f32 %v876_v46, %v428_v58  ;;  %735 = vmatpush.msra.mxu3 %v713_v48 }
 0x2d0   :  { %468 = vmatpush.msrb.mxu1 %v842_v62  ;;  %590 = vmatpush.msra.mxu2 %v837_v61  ;;  %v560_v15 = vor.u32 1.1754944e-38, %v559_v12  ;;  %vm558_vm8 = vcmp.eq.f32.partialorder %v557_v13, 8.507059e+37  ;;  %v709_v61 = vld [vmem:[%s1274_s8 + $0x10] sm:$0xff]  ;;  %v708_v62 = vld [vmem:[%s1274_s8 + $0x8] sm:$0xff] }
 0x2d1   :  { %791 = vmatmul.msk.f32.vlgmr.msrb.gmra.mxu1 %vm148_vm2, %v425_v63  ;;  %797 = vmatmul.msk.f32.vlgmr.msra.gmra.mxu2 %vm148_vm2, %v547_v0  ;;  %v430_v2 = vadd.f32 %v876_v46, %v429_v57 }
 0x2d2   :  { %694 = vmatpush.msra.mxu1 %v671_v33  ;;  %736 = vmatpush.msra.mxu3 %v712_v49 }
 0x2d3   :  { %v878_v6 = vpop.eup %877  ;;  %v434_v8 = vsel %vm433_vm3, %v876_v46, %v430_v2  ;;  %v668_v46 = vld [vmem:[%s1272_s6] sm:$0xff] }
 0x2d4   :  { %v549_v9 = vmul.f32 %v878_v6, %v532_v55  ;;  %v439_v7 = vsel %vm436_vm4, %v438_v3, %v434_v8  ;;  %vm554_vm5 = vweird.f32 %v878_v6  ;;  %695 = vmatpush.msra.mxu1 %v670_v45  ;;  %737 = vmatpush.msra.mxu3 %v711_v50 }
 0x2d5   :  { %v440_v22 = vmul.f32 %v1143_v26, %v439_v7  ;;  %vm555_vm7 = vmor %vm553_vm6, %vm554_vm5 }
 0x2d6   :  { %v550_v11 = vsub.f32 1.0, %v549_v9  ;;  %696 = vmatpush.msra.mxu1 %v669_v16  ;;  %738 = vmatpush.msra.mxu3 %v710_v51 }
 0x2d8   :  { %v551_v60 = vmul.f32 %v878_v6, %v550_v11  ;;  %697 = vmatpush.msra.mxu1 %v668_v46  ;;  %739 = vmatpush.msra.mxu3 %v709_v61 }
 0x2d9   :  { %792 = vmatmul.msk.f32.gmra.mxu1 %vm148_vm2, %v440_v22 }
 0x2da   :  { %v552_v14 = vadd.f32 %v878_v6, %v551_v60  ;;  %740 = vmatpush.msra.mxu3 %v708_v62 }
 0x2dc   :  { %v556_v17 = vsel %vm555_vm7, %v878_v6, %v552_v14  ;;  %v846_v6 = vld [vmem:[%s1275_s9] ss:$0 sm:$0xff] }
 0x2dd   :  { %v561_v18 = vsel %vm558_vm8, %v560_v15, %v556_v17 }
 0x2de   :  { %v562_v19 = vmul.f32 %v1147_v28, %v561_v18  ;;  %v632_v28 = vld [vmem:[%s1270_s4 + $0x18] sm:$0xff] }
 0x2df   :  { %655 = vmatpush.msra.mxu0 %v632_v28 }
 0x2e0   :  { %798 = vmatmul.msk.f32.gmra.mxu2 %vm148_vm2, %v562_v19 }
 0x2e1   :  { %656 = vmatpush.msra.mxu0 %v631_v30 }
 0x2e3   :  { %657 = vmatpush.msra.mxu0 %v630_v31 }
 0x2e5   :  { %658 = vmatpush.msra.mxu0 %v629_v32 }
 0x32a   :  { %v226_v20 = vpop.f32.mrf.mxu2 }
 0x332   :  { %v229_v21 = vpop.f32.mrf.mxu2 }
 0x342   :  { %v348_v23 = vpop.f32.mrf.mxu2 }
 0x34a   :  { %v351_v26 = vpop.f32.mrf.mxu2 }
 0x34e   :  { %v470_v24 = vpop.f32.mrf.mxu1 }
 0x34f   :  { %608 = vrot.lane.b32.xlu1 %v470_v24, %s972_s24 }
 0x354   :  { %v592_v25 = vpop.f32.mrf.mxu2 }
 0x355   :  { %616 = vrot.lane.b32.xlu2 %v592_v25, %s973_s0 }
 0x356   :  { %v473_v27 = vpop.f32.mrf.mxu1 }
 0x357   :  { %610 = vrot.lane.b32.xlu0 %v473_v27, %s972_s24  ;;  %600 = vrot.lane.b32.xlu1 %v348_v23, %s959_s22 }
 0x35f   :  { %602 = vrot.lane.b32.xlu1 %v351_v26, %s959_s22 }
 0x363   :  { %v595_v29 = vpop.f32.mrf.mxu2 }
 0x364   :  { %618 = vrot.lane.b32.xlu2 %v595_v29, %s973_s0 }
 0x3af   :  { %v617_v36 = vpop.permute.xlu2 %616 }
 0x3be   :  { %v619_v42 = vpop.permute.xlu2 %618 }
 0x3c1   :  { %v609_v34 = vpop.permute.xlu1 %608 }
 0x3c9   :  { %v601_v35 = vpop.permute.xlu1 %600  ;;  %v611_v40 = vpop.permute.xlu0 %610 }
 0x3ca   :  { %v622_v10 = vsel %vm116_vm1, %v226_v20, %v601_v35 }
 0x3cb   :  { %v624_v37 = vsel %vm148_vm2, %v622_v10, %v609_v34 }
 0x3cc   :  { %v627_v38 = vsel %vm626_vm9, %v624_v37, %v617_v36 }
 0x3cd   :  { %799 = vmatmul.msk.f32.vlgmr.msra.gmra.mxu0 %vm80_vm0, %v627_v38 }
 0x3d1   :  { %v603_v39 = vpop.permute.xlu1 %602 }
 0x3d2   :  { %v623_v41 = vsel %vm116_vm1, %v229_v21, %v603_v39  ;;  %vm719_vm1 = vcmask 523264  }
 0x3d3   :  { %v625_v43 = vsel %vm148_vm2, %v623_v41, %v611_v40 }
 0x3d4   :  { %v628_v44 = vsel %vm626_vm9, %v625_v43, %v619_v42 }
 0x3d5   :  { %800 = vmatmul.msk.f32.gmra.mxu0 %vm80_vm0, %v628_v44 }
 0x44a   :  { %v660_v53 = vpop.f32.mrf.mxu0 }
 0x44b   :  { %v661_v54 = vadd.f32 %v844_v52, %v660_v53 }
 0x44d   :  { %v666_v55 = vadd.f32 %v661_v54, %v1054_v4  ;;  %v707_v4 = vld [vmem:[%s1274_s8] sm:$0xff] }
 0x44e   :  { %741 = vmatpush.msra.mxu3 %v707_v4 }
 0x44f   :  { %801 = vmatmul.msk.f32.vlgmr.msra.gmra.mxu1 %vm80_vm0, %v666_v55 }
 0x452   :  { %v663_v56 = vpop.f32.mrf.mxu0 }
 0x453   :  { %v664_v58 = vadd.f32 %v844_v52, %v663_v56 }
 0x455   :  { %v667_v59 = vadd.f32 %v664_v58, %v1058_v5  ;;  %v845_v5 = vld [vmem:[%s1273_s7] ss:$0 sm:$0xff]  ;;  %s974_s7 = smov [#allocation7]  }
 0x456   :  { %s757_s8 = sshll.u32 %s974_s7, 4  ;;  %s758_s8 = int_to_ptr.vmem [resolvable:$true] %s757_s8 }
 0x457   :  { %802 = vmatmul.msk.f32.gmra.mxu1 %vm80_vm0, %v667_v59 }
 0x4cc   :  { %v699_v63 = vpop.f32.mrf.mxu1 }
 0x4cd   :  { %v700_v57 = vadd.f32 %v845_v5, %v699_v63 }
 0x4cf   :  { %v705_v0 = vmax.f32 %v700_v57, 0.0 }
 0x4d1   :  { %803 = vmatmul.msk.f32.vlgmr.msra.gmra.mxu3 %vm719_vm1, %v705_v0 }
 0x4d4   :  { %v702_v1 = vpop.f32.mrf.mxu1 }
 0x4d5   :  { %v703_v2 = vadd.f32 %v845_v5, %v702_v1 }
 0x4d7   :  { %v706_v3 = vmax.f32 %v703_v2, 0.0 }
 0x4d9   :  { %804 = vmatmul.msk.f32.gmra.mxu3 %vm719_vm1, %v706_v3 }
 0x554   :  { %v743_v8 = vpop.f32.mrf.mxu3 }
 0x555   :  { %v744_v9 = vadd.f32 %v846_v6, %v743_v8 }
 0x557   :  { %v749_v7 = vadd.f32 %v744_v9, %v666_v55 }
 0x559   :  { %751 = vst.msk [vmem:[#allocation7] sm:$0xff] %vm80_vm0, %v749_v7 }
 0x55c   :  { %v746_v11 = vpop.f32.mrf.mxu3 }
 0x55d   :  { %v747_v12 = vadd.f32 %v846_v6, %v746_v11 }
 0x55f   :  { %v750_v22 = vadd.f32 %v747_v12, %v667_v59 }
 0x561   :  { %752 = vst.msk [vmem:[#allocation7 + $0x8] sm:$0xff] %vm80_vm0, %v750_v22 }
 0x562   :  { %765 = dma.vmem_to_hbm [thread:$0]  %s758_s8, 256, %s760_s16, [#allocation4], %s958_s21, %s958_s21, %s959_s22  }
 0x563   :  { %955 = dma.done.wait [#allocation4], 256  }
 0x564   :  { %956 = vsyncadd [#allocation4], 4294967040 }
 0x565   :  { %770 = vsyncpa [#allocation3], 1 }
 0x566   :  { %771 = vsyncpa [#allocation6], 1 }
 0x567   :  { %772 = vsyncpa [#allocation4], 1 }

</bundles_post_ra>
